<compile_context>
chip_gen: v7x
topology: tpu7x:2x2x1
jax: 0.10.0
libtpu: 0.0.40
codegen_flags: <defaults>
</compile_context>

<pallas_src>
from functools import partial

import jax
import jax.numpy as jnp
from jax.experimental import pallas as pl
from jax.experimental.pallas import tpu as pltpu

NEG_SLOPE = 0.01   # F.leaky_relu default
EPS = 1e-12        # F.normalize default eps
LANE = 128


def _round_up(x, m):
    return (x + m - 1) // m * m


# ----------------------------- encoder kernel -------------------------------
def _encoder_kernel(content_ref, w1_ref, b1_ref, w2_ref, b2_ref, out_ref):
    # content/w1/w2 are bf16 (MXU-native); accumulate in f32.
    h = jnp.dot(content_ref[...], w1_ref[...],
                preferred_element_type=jnp.float32) + b1_ref[...]
    h = jnp.where(h > 0, h, NEG_SLOPE * h)            # leaky_relu in f32 (v5e-safe VPU)
    out_ref[...] = (jnp.dot(h.astype(jnp.bfloat16), w2_ref[...],
                            preferred_element_type=jnp.float32)
                    + b2_ref[...]).astype(out_ref.dtype)


def encoder(content, w1, b1, w2, b2, *, tile_rows=512,
            vmem_limit_bytes=48 * 1024 * 1024):
    """Linear(content_dim,256) -> leaky_relu -> Linear(256,emb_pad).

    Grid-tiled over rows; weights stay VMEM-resident via index_map (0,0).
    w2/b2 must be zero-padded so emb_pad is a multiple of 128 (lane-dense
    output stores + full MXU N utilization).  tile_rows should be a multiple
    of 16 (bf16 sublane packing); on v7x (64 MiB VMEM) use a smaller tile for
    very wide content dims.
    """
    rows, cdim = content.shape
    hid = w1.shape[1]
    emb_pad = w2.shape[1]

    rows_pad = _round_up(rows, 8)
    tm = min(tile_rows, rows_pad)
    rows_pad = _round_up(rows_pad, tm)
    if rows_pad != rows:
        content = jnp.pad(content, ((0, rows_pad - rows), (0, 0)))

    out = pl.pallas_call(
        _encoder_kernel,
        out_shape=jax.ShapeDtypeStruct((rows_pad, emb_pad), jnp.float32),
        grid=(rows_pad // tm,),
        in_specs=[
            pl.BlockSpec((tm, cdim), lambda i: (i, 0)),     # streamed row tile
            pl.BlockSpec((cdim, hid), lambda i: (0, 0)),    # resident weights
            pl.BlockSpec((1, hid), lambda i: (0, 0)),
            pl.BlockSpec((hid, emb_pad), lambda i: (0, 0)),
            pl.BlockSpec((1, emb_pad), lambda i: (0, 0)),
        ],
        out_specs=pl.BlockSpec((tm, emb_pad), lambda i: (i, 0)),
        compiler_params=pltpu.CompilerParams(
            dimension_semantics=("parallel",),   # v7x: shard row tiles over 2 TCs
            vmem_limit_bytes=vmem_limit_bytes),
    )(content.astype(jnp.bfloat16), w1.astype(jnp.bfloat16), b1,
      w2.astype(jnp.bfloat16), b2)
    return out[:rows]


# ------------------------------- loss kernel --------------------------------
def _loss_kernel(pos_emb_ref, item_feat_ref, user_emb_ref, item_input_ref,
                 item_emb_ref, cl_ref, reg_ref, *, temp, lr_lambda, batch, group):
    # pos_emb_ref: (B, 1, E); all others: (B, K, E), K = 1 + num_neg.
    # Whole batch lives in one block (tiny); if B grows large, tile over a grid
    # with pl.when init/finalize accumulation of the sums below.
    inv_temp = 1.0 / temp

    def l2norm(x):  # == F.normalize(x, dim=-1): x / max(||x||, EPS)
        ss = jnp.sum(x * x, axis=-1, keepdims=True)
        return x * jax.lax.rsqrt(jnp.maximum(ss, EPS * EPS))

    def contrastive(anchor, other):
        # stabilized: -log(exp(l0)/sum exp(lj)) = logsumexp(l) - l0  (no divide)
        logits = jnp.sum(anchor * other, axis=-1) * inv_temp            # (B, K)
        m = jnp.max(logits, axis=-1, keepdims=True)                     # (B, 1)
        lse = m + jnp.log(jnp.sum(jnp.exp(logits - m), axis=-1, keepdims=True))
        per = lse - logits[:, 0:1]                                      # (B, 1)
        return jnp.sum(per, keepdims=True) * (1.0 / batch)              # (1, 1)

    cl1 = contrastive(l2norm(pos_emb_ref[...]), l2norm(item_feat_ref[...]))

    u = user_emb_ref[...]
    cl2 = contrastive(u, item_input_ref[...])

    ie = item_emb_ref[...]
    inv_bk = 1.0 / (batch * group)
    mean_u = jnp.sum(jnp.sqrt(jnp.sum(u * u, axis=-1)), keepdims=True) * inv_bk
    mean_i = jnp.sum(jnp.sqrt(jnp.sum(ie * ie, axis=-1)), keepdims=True) * inv_bk

    cl_ref[...] = cl1 * lr_lambda + cl2 * (1.0 - lr_lambda)
    reg_ref[...] = (mean_u + mean_i) * 0.5


def clcrec_losses(pos_item_embedding, all_item_feat, user_embedding,
                  all_item_input, all_item_embedding, *, temp, lr_lambda):
    B, K, _ = all_item_feat.shape
    kernel = partial(_loss_kernel, temp=float(temp), lr_lambda=float(lr_lambda),
                     batch=B, group=K)
    cl, reg = pl.pallas_call(
        kernel,
        out_shape=(jax.ShapeDtypeStruct((1, 1), jnp.float32),
                   jax.ShapeDtypeStruct((1, 1), jnp.float32)),
        in_specs=[pl.BlockSpec(memory_space=pltpu.MemorySpace.VMEM)] * 5,
        out_specs=(pl.BlockSpec(memory_space=pltpu.MemorySpace.VMEM),
                   pl.BlockSpec(memory_space=pltpu.MemorySpace.VMEM)),
    )(pos_item_embedding, all_item_feat, user_embedding,
      all_item_input, all_item_embedding)
    return cl[0, 0], reg[0, 0]


# ------------------------------ pure-JAX reference --------------------------
def ref_forward(item_content, w1, b1, w2, b2, user_emb, item_emb,
                user_tensor, item_tensor, rand_index, temp, lr_lambda,
                matmul_dtype=jnp.float32):
    """Faithful re-implementation of CLCRec_Learner.forward.

    matmul_dtype=bfloat16 mirrors the kernel's MXU dtype policy (bf16 operands,
    f32 accumulation); float32 gives the exact PyTorch f32 numerics.
    """
    B, K = item_tensor.shape
    pos_flat = jnp.repeat(item_tensor[:, 0:1], K, axis=1).reshape(-1)
    user_flat = user_tensor.reshape(-1)
    item_flat = item_tensor.reshape(-1)

    c = item_content.astype(matmul_dtype)
    h = jnp.dot(c, w1.astype(matmul_dtype),
                preferred_element_type=jnp.float32) + b1
    h = jnp.where(h > 0, h, NEG_SLOPE * h)
    feature = jnp.dot(h.astype(matmul_dtype), w2.astype(matmul_dtype),
                      preferred_element_type=jnp.float32) + b2

    all_item_feat = feature[item_flat]
    user_embedding = user_emb[user_flat]
    pos_item_embedding = item_emb[pos_flat]
    all_item_embedding = item_emb[item_flat]

    def normalize(x):
        return x / jnp.maximum(jnp.sqrt(jnp.sum(x * x, 1, keepdims=True)), EPS)

    def loss_c(a, o):
        s = jnp.exp(jnp.sum(a * o, axis=1) / temp).reshape(-1, K)
        return jnp.mean(-jnp.log(s[:, 0] / jnp.sum(s, axis=1)))

    all_item_input = all_item_embedding.at[rand_index].set(all_item_feat[rand_index])
    cl1 = loss_c(normalize(pos_item_embedding), normalize(all_item_feat))
    cl2 = loss_c(user_embedding, all_item_input)
    reg = (jnp.mean(jnp.sqrt(jnp.sum(user_embedding ** 2, 1)))
           + jnp.mean(jnp.sqrt(jnp.sum(all_item_embedding ** 2, 1)))) / 2
    return cl1 * lr_lambda + cl2 * (1 - lr_lambda), reg


# ----------------------------------- main ------------------------------------
if __name__ == "__main__":
    key = jax.random.PRNGKey(0)
    user_num, item_num = 12, 16
    content_dim, emb = 64, 32
    B, num_neg = 8, 3
    K = 1 + num_neg
    temp_value, lr_lambda, num_sample = 0.2, 0.5, 0.5
    EMB_PAD = _round_up(emb, LANE)   # lane-dense last dim (128)

    keys = jax.random.split(key, 10)
    # deterministic synthetic parameters (shapes per CLCRec_Learner.__init__)
    item_content = jax.random.normal(keys[0], (item_num, content_dim), jnp.float32)
    w1 = jax.random.normal(keys[1], (content_dim, 256), jnp.float32) * (2.0 / content_dim) ** 0.5
    b1 = jax.random.normal(keys[2], (1, 256), jnp.float32) * 0.01
    w2 = jax.random.normal(keys[3], (256, emb), jnp.float32) * (2.0 / 256) ** 0.5
    b2 = jax.random.normal(keys[4], (1, emb), jnp.float32) * 0.01
    user_emb = jax.random.normal(keys[5], (user_num, emb), jnp.float32) * 0.1
    item_emb = jax.random.normal(keys[6], (item_num, emb), jnp.float32) * 0.1
    # NOTE: MLP, att_weight_1/2, bias, att_sum_layer are declared in __init__ but
    # never used in forward(), so they are omitted here.

    users = jax.random.randint(keys[7], (B,), 0, user_num)
    user_tensor = jnp.tile(users[:, None], (1, K))                    # (B, K)
    item_tensor = jax.random.randint(keys[8], (B, K), 0, item_num)    # (B, K)

    # -------- forward glue (mirrors CLCRec_Learner.forward) --------
    user_flat = user_tensor.reshape(-1)
    item_flat = item_tensor.reshape(-1)
    N = B * K

    # Zero-pad the embedding dim to 128: padded encoder-output / table columns
    # are exact zeros, so norms, dot products and losses are unchanged.
    w2_p = jnp.pad(w2, ((0, 0), (0, EMB_PAD - emb)))
    b2_p = jnp.pad(b2, ((0, 0), (0, EMB_PAD - emb)))
    user_emb_p = jnp.pad(user_emb, ((0, 0), (0, EMB_PAD - emb)))
    item_emb_p = jnp.pad(item_emb, ((0, 0), (0, EMB_PAD - emb)))

    # Only the gathered B*K rows feed the loss -> encode just those rows
    # (row-wise identical to encoding the full table then gathering; call
    # encoder() on the full item_content for get_all_embs-style uses).
    gathered_content = item_content[item_flat]                        # (B*K, content_dim)
    all_item_feat = encoder(gathered_content, w1, b1, w2_p, b2_p,
                            tile_rows=16)                             # Pallas kernel 1 (grid=(2,))

    user_embedding = user_emb_p[user_flat]                            # (B*K, 128)
    pos_item_embedding = item_emb_p[item_tensor[:, 0]]                # (B, 128) -- not repeated K times
    all_item_embedding = item_emb_p[item_flat]                        # (B*K, 128)

    # deterministic stand-in for torch.randint row sampling (glue, not a kernel op)
    rand_index = jax.random.randint(keys[9], (int(N * num_sample),), 0, N)
    all_item_input = all_item_embedding.at[rand_index].set(all_item_feat[rand_index])

    to3 = lambda x: x.reshape(B, K, EMB_PAD)
    cl, reg = clcrec_losses(pos_item_embedding.reshape(B, 1, EMB_PAD),  # Pallas kernel 2
                            to3(all_item_feat), to3(user_embedding),
                            to3(all_item_input), to3(all_item_embedding),
                            temp=temp_value, lr_lambda=lr_lambda)
    cl, reg = jax.block_until_ready((cl, reg))

    # Reference with the same bf16-MXU / f32-accumulate policy (tight tolerance).
    cl_ref, reg_ref = ref_forward(item_content, w1, b1, w2, b2, user_emb, item_emb,
                                  user_tensor, item_tensor, rand_index,
                                  temp_value, lr_lambda, matmul_dtype=jnp.bfloat16)
    assert jnp.allclose(cl, cl_ref, atol=2e-3, rtol=2e-3), (cl, cl_ref)
    assert jnp.allclose(reg, reg_ref, atol=2e-3, rtol=2e-3), (reg, reg_ref)

    # Full-f32 reference (exact PyTorch numerics) as a loose sanity check on the
    # bf16 MXU operands.
    cl32, reg32 = ref_forward(item_content, w1, b1, w2, b2, user_emb, item_emb,
                              user_tensor, item_tensor, rand_index,
                              temp_value, lr_lambda, matmul_dtype=jnp.float32)
    assert jnp.allclose(cl, cl32, atol=1e-1, rtol=1e-1), (cl, cl32)
    assert jnp.allclose(reg, reg32, atol=1e-1, rtol=1e-1), (reg, reg32)
    print("KERNEL_OK")
</pallas_src>

<mosaic_0001>
module attributes {stable_mosaic.version = 11 : i64} {
  func.func @_encoder_kernel(%arg0: i32, %arg1: memref<16x64xbf16, #tpu.memory_space<vmem>>, %arg2: memref<64x256xbf16, #tpu.memory_space<vmem>>, %arg3: memref<1x256xf32, #tpu.memory_space<vmem>>, %arg4: memref<256x128xbf16, #tpu.memory_space<vmem>>, %arg5: memref<1x128xf32, #tpu.memory_space<vmem>>, %arg6: memref<16x128xf32, #tpu.memory_space<vmem>>) attributes {dimension_semantics = [#tpu.dimension_semantics<parallel>], iteration_bounds = array<i64: 2>, scalar_prefetch = 0 : i64, scratch_operands = 0 : i64, tpu.core_type = #tpu.core_type<tc>, window_params = [{transform_indices = @transform_0, window_bounds = array<i64: 16, 64>}, {pipeline_mode = #tpu.pipeline_mode<synchronous>, transform_indices = @transform_1, window_bounds = array<i64: 64, 256>}, {pipeline_mode = #tpu.pipeline_mode<synchronous>, transform_indices = @transform_2, window_bounds = array<i64: 1, 256>}, {pipeline_mode = #tpu.pipeline_mode<synchronous>, transform_indices = @transform_3, window_bounds = array<i64: 256, 128>}, {pipeline_mode = #tpu.pipeline_mode<synchronous>, transform_indices = @transform_4, window_bounds = array<i64: 1, 128>}, {transform_indices = @transform_5, window_bounds = array<i64: 16, 128>}]} {
    %c0 = arith.constant 0 : index
    %c0_0 = arith.constant 0 : index
    %0 = vector.load %arg1[%c0, %c0_0] : memref<16x64xbf16, #tpu.memory_space<vmem>>, vector<16x64xbf16>
    %c0_1 = arith.constant 0 : index
    %c0_2 = arith.constant 0 : index
    %1 = vector.load %arg2[%c0_1, %c0_2] : memref<64x256xbf16, #tpu.memory_space<vmem>>, vector<64x256xbf16>
    %cst = arith.constant dense<0.000000e+00> : vector<16x256xf32>
    %2 = tpu.matmul %0, %1, %cst {dimension_numbers = #tpu.dot_dimension_numbers<[1], [0], [0], [1], [0, 0, 1, 1], [], []>} : vector<16x64xbf16>, vector<64x256xbf16>, vector<16x256xf32> -> vector<16x256xf32>
    %c0_3 = arith.constant 0 : index
    %c0_4 = arith.constant 0 : index
    %3 = vector.load %arg3[%c0_3, %c0_4] : memref<1x256xf32, #tpu.memory_space<vmem>>, vector<1x256xf32>
    %4 = vector.broadcast %3 : vector<1x256xf32> to vector<16x256xf32>
    %5 = arith.addf %2, %4 : vector<16x256xf32>
    %cst_5 = arith.constant 0.000000e+00 : f32
    %6 = vector.broadcast %cst_5 : f32 to vector<16x256xf32>
    %7 = arith.cmpf ogt, %5, %6 : vector<16x256xf32>
    %cst_6 = arith.constant 0.00999999977 : f32
    %8 = vector.broadcast %cst_6 : f32 to vector<16x256xf32>
    %9 = arith.mulf %8, %5 : vector<16x256xf32>
    %10 = arith.select %7, %5, %9 : vector<16x256xi1>, vector<16x256xf32>
    %11 = arith.truncf %10 : vector<16x256xf32> to vector<16x256xbf16>
    %c0_7 = arith.constant 0 : index
    %c0_8 = arith.constant 0 : index
    %12 = vector.load %arg4[%c0_7, %c0_8] : memref<256x128xbf16, #tpu.memory_space<vmem>>, vector<256x128xbf16>
    %cst_9 = arith.constant dense<0.000000e+00> : vector<16x128xf32>
    %13 = tpu.matmul %11, %12, %cst_9 {dimension_numbers = #tpu.dot_dimension_numbers<[1], [0], [0], [1], [0, 0, 1, 1], [], []>} : vector<16x256xbf16>, vector<256x128xbf16>, vector<16x128xf32> -> vector<16x128xf32>
    %c0_10 = arith.constant 0 : index
    %c0_11 = arith.constant 0 : index
    %14 = vector.load %arg5[%c0_10, %c0_11] : memref<1x128xf32, #tpu.memory_space<vmem>>, vector<1x128xf32>
    %15 = vector.broadcast %14 : vector<1x128xf32> to vector<16x128xf32>
    %16 = arith.addf %13, %15 : vector<16x128xf32>
    %c0_12 = arith.constant 0 : index
    %c0_13 = arith.constant 0 : index
    %17 = vector.load %arg6[%c0_12, %c0_13] : memref<16x128xf32, #tpu.memory_space<vmem>>, vector<16x128xf32>
    tpu.vector_store %arg6[%c0_12, %c0_13], %16 {strides = array<i32>} : memref<16x128xf32, #tpu.memory_space<vmem>>, vector<16x128xf32>,
    return
  }
  func.func @transform_0(%arg0: i32) -> (i32, i32) {
    %c0_i32 = arith.constant 0 : i32
    %c0_i32_0 = arith.constant 0 : i32
    return %arg0, %c0_i32 : i32, i32
  }
  func.func @transform_1(%arg0: i32) -> (i32, i32) {
    %c0_i32 = arith.constant 0 : i32
    %c0_i32_0 = arith.constant 0 : i32
    %c0_i32_1 = arith.constant 0 : i32
    return %c0_i32, %c0_i32_0 : i32, i32
  }
  func.func @transform_2(%arg0: i32) -> (i32, i32) {
    %c0_i32 = arith.constant 0 : i32
    %c0_i32_0 = arith.constant 0 : i32
    %c0_i32_1 = arith.constant 0 : i32
    return %c0_i32, %c0_i32_0 : i32, i32
  }
  func.func @transform_3(%arg0: i32) -> (i32, i32) {
    %c0_i32 = arith.constant 0 : i32
    %c0_i32_0 = arith.constant 0 : i32
    %c0_i32_1 = arith.constant 0 : i32
    return %c0_i32, %c0_i32_0 : i32, i32
  }
  func.func @transform_4(%arg0: i32) -> (i32, i32) {
    %c0_i32 = arith.constant 0 : i32
    %c0_i32_0 = arith.constant 0 : i32
    %c0_i32_1 = arith.constant 0 : i32
    return %c0_i32, %c0_i32_0 : i32, i32
  }
  func.func @transform_5(%arg0: i32) -> (i32, i32) {
    %c0_i32 = arith.constant 0 : i32
    %c0_i32_0 = arith.constant 0 : i32
    return %arg0, %c0_i32 : i32, i32
  }
}

</mosaic_0001>

<bundles_post_ra>
// kernel: tpu_custom_call.1
= control target key start
LH: loop header
LB: loop body
LE: loop exit
PB: predicated region body
PF: predicated region fallthrough
CT: control target
= control target key end

     0   :  { %10 = vsyncpa [#allocation3], 0  ;;  %s1305_s0 = inlined_call_operand.hbm [shape: bf16[32,64], index: 0, kind: input, shape index: {}]   ;;  %s1306_s1 = inlined_call_operand.hbm [shape: bf16[64,256], index: 1, kind: input, shape index: {}]   ;;  %s1307_s2 = inlined_call_operand.vmem [shape: f32[1,256], index: 2, kind: input, shape index: {}]   ;;  %s1308_s3 = inlined_call_operand.hbm [shape: bf16[256,128], index: 3, kind: input, shape index: {}]   ;;  %s1309_s4 = inlined_call_operand.vmem [shape: f32[1,128], index: 4, kind: input, shape index: {}]   ;;  %s1310_s5 = inlined_call_operand.hbm [shape: f32[32,128], index: 5, kind: output, shape index: {}]  }
   0x1   :  { %12 = vsyncpa [#allocation3 + $0x1], 0 }
   0x2   :  { %13 = vsyncpa [#allocation6], 0 }
   0x3   :  { %14 = vsyncpa [#allocation4], 0 }
   0x4   :  { %16 = vsyncpa [#allocation4 + $0x1], 0  ;;  %s1058_s18 = smov 0   ;;  %s1060_s19 = smov 0  }
   0x5   :  { %s1062_s20 = smov 0   ;;  %s1064_s21 = smov 0  }
   0x6 LB: > { %s1079_s22 = sadd.s32 4294967295, %s1015_s21   ;;  %s687_s23 = sadd.s32 4294967294, %s1015_s21   ;;  %s1015_s21 = sphi %s1064_s21, %s1330_s21   ;;  %s1011_s20 = sphi %s1062_s20, %s1329_s20   ;;  %s1007_s19 = sphi %s1060_s19, %s1328_s19   ;;  %s1003_s18 = sphi %s1058_s18, %s1327_s18  }
   0x7   : > { %p42_p0 = scmp.ne.s32.totalorder %s1007_s19, %s1003_s18  ;;  %p1311_p1 = scmp.eq.s32.totalorder %s1079_s22, 0 }
   0x8   : > { %p156_p3 = scmp.eq.s32.totalorder %s687_s23, 1  ;;  %p688_p5 = scmp.ge.s32.totalorder %s1015_s21, 1 }
   0x9   : > { %p1088_p4 = por %p1311_p1, %p42_p0  ;;  %p163_p7 = scmp.lt.s32.totalorder %s1015_s21, 3 }
   0xa   : > { %p1093_p6 = por %p156_p3, %p42_p0  ;;  %s1017_s27 = smov [#allocation5]  }
   0xb   : > { %s1314_s24 = scalar_select %p1088_p4, 1, 0 }
   0xc   : > { %s1315_s25 = scalar_select %p1093_p6, 1, 0 }
   0xd   : > { %p1098_p8 = pnand %p688_p5, %p163_p7  ;;  %s175_s28 = sshll.u32 %s1017_s27, 4  ;;  %s1102_s28 = int_to_ptr.vmem [resolvable:$true] %s175_s28 }
   0xe   : > { %s1018_s30 = smov [#allocation7]   ;;  %s859_s9 = scalar_lea.hbm %s1306_s1, 1024 }
   0xf   : > { %p768_p9 = pneg %p1098_p8  ;;  %s191_s6 = sshll.u32 %s1018_s30, 4  ;;  %s1113_s6 = int_to_ptr.vmem [resolvable:$true] %s191_s6 }
  0x10   : > { %p860_p12 = scmp.ne.s32.totalorder %s1306_s1, %s859_s9  ;;  %p866_p5 = scmp.lt.u32.totalorder %s859_s9, %s1306_s1 }
  0x11   : > { %p1109_p11 = pnand %p768_p9, %p1311_p1 }
  0x13   : > { %p861_p13 = pneg %p1109_p11 }
  0x15   : > { %p862_p0 = pnand %p861_p13, %p860_p12 }
  0x17   : > { %p863_p3 = pneg %p862_p0 }
  0x19   : > { %p868_p7 = pnand %p866_p5, %p863_p3 }
  0x1b   : > { %871 = shalt.err (!%p868_p7)
}
  0x1c   : > { %s872_s14 = scalar_lea.vmem %s1102_s28, 1024  ;;  %p880_p2 = scmp.lt.s32.totalorder %s1102_s28, %s1102_s28 }
  0x1d   : > { %p873_p9 = scmp.ne.s32.totalorder %s1102_s28, %s872_s14  ;;  %p881_p12 = scmp.lt.s32.totalorder %s872_s14, %s872_s14 }
  0x1f   : > { %p875_p10 = pnand %p873_p9, %p861_p13  ;;  %p882_p0 = por %p881_p12, %p880_p2 }
  0x21   : > { %p876_p1 = pneg %p875_p10 }
  0x23   : > { %p883_p6 = pnand %p882_p0, %p876_p1 }
  0x25   : > { %886 = shalt.err (!%p883_p6)
}
  0x26   : > { %s1019_s15 = smov 128   ;;  %s1020_s16 = smov 8  }
  0x27   : > { %771 = dma.hbm_to_vmem [thread:$0]  (!%p1109_p11), %s1306_s1, 1024, %s1102_s28, [#allocation6], %s1019_s15, %s1019_s15, %s1020_s16  }
  0x28   : > { %s887_s7 = scalar_lea.hbm %s1308_s3, 2048 }
  0x29   : > { %p888_p2 = scmp.ne.s32.totalorder %s1308_s3, %s887_s7  ;;  %p894_p10 = scmp.lt.u32.totalorder %s887_s7, %s1308_s3 }
  0x2b   : > { %p890_p1 = pnand %p888_p2, %p861_p13 }
  0x2d   : > { %p891_p6 = pneg %p890_p1 }
  0x2f   : > { %p896_p3 = pnand %p894_p10, %p891_p6 }
  0x31   : > { %899 = shalt.err (!%p896_p3)
}
  0x32   : > { %s900_s28 = scalar_lea.vmem %s1113_s6, 2048  ;;  %p908_p12 = scmp.lt.s32.totalorder %s1113_s6, %s1113_s6 }
  0x33   : > { %p901_p5 = scmp.ne.s32.totalorder %s1113_s6, %s900_s28  ;;  %p909_p0 = scmp.lt.s32.totalorder %s900_s28, %s900_s28 }
  0x35   : > { %p903_p7 = pnand %p901_p5, %p861_p13  ;;  %p910_p2 = por %p909_p0, %p908_p12 }
  0x37   : > { %p904_p9 = pneg %p903_p7 }
  0x39   : > { %p911_p1 = pnand %p910_p2, %p904_p9 }
  0x3b   : > { %914 = shalt.err (!%p911_p1)
}
  0x3c   : > { %s1021_s12 = smov 64   ;;  %s1022_s13 = smov 4  }
  0x3d   : > { %774 = dma.hbm_to_vmem [thread:$0]  (!%p1109_p11), %s1308_s3, 2048, %s1113_s6, [#allocation6], %s1021_s12, %s1021_s12, %s1022_s13  }
  0x3e   : > { %s1171_s16 = sadd.s32 1, %s1015_s21   ;;  %s29_s23 = sadd.s32 1, %s1011_s20 }
  0x3f   : > { %s26_s17 = ssub.s32 %s1015_s21, %s1171_s16  ;;  %p36_p6 = scmp.ne.s32.totalorder %s1011_s20, %s1007_s19 }
  0x40   : > { %p27_p13 = scmp.eq.s32.totalorder %s26_s17, 0  ;;  %p37_p10 = scmp.eq.s32.totalorder %s1015_s21, 0 }
  0x41   : > { %p1318_p5 = scmp.eq.s32.totalorder %s1079_s22, 1  ;;  %p785_p9 = scmp.lt.s32.totalorder %s1015_s21, 2 }
  0x42   : > { %s1180_s27 = scalar_select %p27_p13, %s1011_s20, %s29_s23  }
  0x43   : > { %p38_p3 = por %p37_p10, %p36_p6  ;;  %p1184_p7 = por %p1318_p5, %p36_p6 }
  0x44   : > { %s208_s30 = sand.u32 1, %s1011_s20   ;;  %s732_s6 = sshll.u32 %s1015_s21, 7 }
  0x45   : > { %s1319_s29 = scalar_select %p1184_p7, 1, 0 }
  0x46   : > { %s692_s7 = sshll.u32 %s208_s30, 3  ;;  %s1194_s10 = scalar_lea.hbm %s1305_s0, %s732_s6 }
  0x47   : > { %s212_s11 = scalar_lea.vmem [#allocation2], %s692_s7  ;;  %p1198_p11 = pnand %p785_p9, %p38_p3 }
  0x48   : > { %s219_s28 = sshll.u32 %s212_s11, 4  ;;  %s1202_s15 = scalar_lea.sflag [#allocation3], %s208_s30  ;;  %s1196_s28 = int_to_ptr.vmem [resolvable:$true] %s219_s28 }
  0x49   : > { %s915_s17 = scalar_lea.hbm %s1194_s10, 128  ;;  %p917_p0 = pneg %p1198_p11 }
  0x4a   : > { %p916_p12 = scmp.ne.s32.totalorder %s1194_s10, %s915_s17  ;;  %s920_s6 = scalar_lea.hbm %s1305_s0, 256 }
  0x4b   : > { %p921_p13 = scmp.lt.u32.totalorder %s1194_s10, %s1305_s0  ;;  %p922_p6 = scmp.lt.u32.totalorder %s920_s6, %s915_s17 }
  0x4c   : > { %p918_p2 = pnand %p917_p0, %p916_p12  ;;  %p924_p3 = scmp.lt.u32.totalorder %s915_s17, %s1194_s10 }
  0x4d   : > { %p923_p10 = por %p922_p6, %p921_p13 }
  0x4e   : > { %p919_p1 = pneg %p918_p2 }
  0x4f   : > { %p925_p5 = por %p924_p3, %p923_p10 }
  0x51   : > { %p926_p9 = pnand %p925_p5, %p919_p1 }
  0x53   : > { %929 = shalt.err (!%p926_p9)
}
  0x54   : > { %s930_s30 = scalar_lea.vmem %s1196_s28, 128  ;;  %s1023_s11 = smov [#allocation2]  }
  0x55   : > { %p931_p12 = scmp.ne.s32.totalorder %s1196_s28, %s930_s30  ;;  %s935_s23 = sshll.u32 %s1023_s11, 4  ;;  %s936_s23 = int_to_ptr.vmem [resolvable:$false] %s935_s23 }
  0x56   : > { %s937_s7 = scalar_lea.vmem %s936_s23, 256  ;;  %p938_p4 = scmp.lt.s32.totalorder %s1196_s28, %s936_s23 }
  0x57   : > { %p933_p2 = pnand %p931_p12, %p917_p0  ;;  %p939_p13 = scmp.lt.s32.totalorder %s937_s7, %s930_s30 }
  0x59   : > { %p934_p7 = pneg %p933_p2  ;;  %p940_p6 = por %p939_p13, %p938_p4 }
  0x5b   : > { %p941_p10 = pnand %p940_p6, %p934_p7 }
  0x5d   : > { %944 = shalt.err (!%p941_p10)
}
  0x5e   : > { %778 = dma.hbm_to_vmem [thread:$0]  (!%p1198_p11), %s1194_s10, 128, %s1196_s28, %s1202_s15, %s1021_s12, %s1021_s12, %s1022_s13  }
  0x5f   : > { %231 = sbr.rel (%p1098_p8) target bundleno = 580 (0x244), region = 40  ;;  %s1236_s17 = sand.u32 (!%p1098_p8), 1, %s1007_s19  }
  0x60   : > { %s696_s6 = sshll.u32 (!%p1098_p8), %s1236_s17, 3  ;;  %s234_s8 = scalar_lea.sflag (!%p1098_p8), [#allocation3], %s1236_s17 }
  0x61   : > { %s237_s9 = scalar_lea.vmem (!%p1098_p8), [#allocation2], %s696_s6  ;;  %p1321_p4 = scmp.ne.s32.totalorder (!%p1098_p8), %s1314_s24, 0 }
  0x66   : > { %990 = dma.done.wait (%p1321_p4), %s234_s8, 128  }
  0x67   : > { %992 = vsyncadd (%p1321_p4), %s234_s8, 4294967168  ;;  %p1322_p7 = scmp.eq.s32.totalorder %s1079_s22, 0 }
  0x69   : > { %994 = dma.done.wait (%p1322_p7), [#allocation6], 3072   ;;  %p1323_p11 = pmov %p1322_p7 }
  0x6a   : > { %v1024_v0 = vmov 0   ;;  %v830_v1 = vld [vmem:[#allocation5 + $0x4] ss:$8 sps:$4 sm:$0xff]   ;;  %v832_v2 = vld [vmem:[#allocation5] ss:$8 sps:$4 sm:$0xff]   ;;  %v847_v13 = vld [vmem:[#allocation7 + $0x50] sm:$0xff]   ;;  %v287_v26 = vlaneseq }
  0x6b   : > { %996 = vsyncadd (%p1323_p11), [#allocation6], 4294964224  ;;  %378 = vmatprep.mubr.bf16.mxu0 %v1024_v0  ;;  %346 = vmatprep.subr.bf16.mxu0 %v830_v1  ;;  %v833_v3 = vld [vmem:[#allocation5 + $0x14] ss:$8 sps:$4 sm:$0xff]   ;;  %v835_v4 = vld [vmem:[#allocation5 + $0x10] ss:$8 sps:$4 sm:$0xff]  }
  0x6c   : > { %347 = vmatpush1.bf16.msra.mxu0 %v832_v2  ;;  %v836_v5 = vld [vmem:[#allocation5 + $0x24] ss:$8 sps:$4 sm:$0xff]   ;;  %v838_v6 = vld [vmem:[#allocation5 + $0x20] ss:$8 sps:$4 sm:$0xff]   ;;  %v839_v7 = vld [vmem:[#allocation5 + $0x34] ss:$8 sps:$4 sm:$0xff]  }
  0x6d   : > { %348 = vmatprep.subr.bf16.mxu0 %v833_v3  ;;  %v843_v8 = vld [vmem:[#allocation7 + $0x40] sm:$0xff]   ;;  %v841_v10 = vld [vmem:[#allocation5 + $0x30] ss:$8 sps:$4 sm:$0xff]   ;;  %v845_v11 = vld [vmem:[#allocation7 + $0x48] sm:$0xff]   ;;  %vm342_vm0 = vcmask 523264   ;;  %v288_v27 = vshrl.u32 %v287_v26, 7 }
  0x6e   : > { %v844_v9 = vld [vmem:[#allocation7] sm:$0xff]   ;;  %734 = vmatprep.subr.bf16.mxu1 %v843_v8  ;;  %v846_v12 = vld [vmem:[#allocation7 + $0x8] sm:$0xff]   ;;  %v842_v14 = vld [vmem:[%s237_s9] sm:$0xff]   ;;  %s699_s12 = sshll.u32 %s1236_s17, 4  ;;  %s733_s15 = sshll.u32 %s1079_s22, 8 }
  0x6f   : > { %735 = vmatpush3.bf16.msra.mxu1 %v844_v9  ;;  %v848_v15 = vld [vmem:[#allocation7 + $0x10] sm:$0xff]   ;;  %v849_v16 = vld [vmem:[#allocation7 + $0x58] sm:$0xff]   ;;  %v851_v18 = vld [vmem:[#allocation7 + $0x60] sm:$0xff]   ;;  %v289_v28 = vsub.s32 0, %v288_v27  ;;  %v293_v30 = vsub.s32 1, %v288_v27  ;;  %s271_s28 = scalar_lea.vmem [#allocation8], %s699_s12  ;;  %s1261_s23 = scalar_lea.hbm %s1310_s5, %s733_s15 }
  0x70   : > { %349 = vmatpush1.bf16.msra.mxu0 %v835_v4  ;;  %736 = vmatprep.subr.bf16.mxu1 %v845_v11  ;;  %v850_v17 = vld [vmem:[#allocation7 + $0x18] sm:$0xff]   ;;  %v852_v19 = vld [vmem:[#allocation7 + $0x20] sm:$0xff]   ;;  %v853_v20 = vld [vmem:[#allocation7 + $0x68] sm:$0xff]   ;;  %s595_s14 = sshll.u32 %s271_s28, 4  ;;  %s582_s7 = scalar_lea.sflag [#allocation4], %s1236_s17  ;;  %s1256_s14 = int_to_ptr.vmem [resolvable:$true] %s595_s14 }
  0x71   : > { %350 = vmatprep.subr.bf16.mxu0 %v836_v5  ;;  %v854_v21 = vld [vmem:[#allocation7 + $0x28] sm:$0xff]   ;;  %v855_v22 = vld [vmem:[#allocation7 + $0x70] sm:$0xff]   ;;  %v857_v24 = vld [vmem:[#allocation7 + $0x78] sm:$0xff]   ;;  %s945_s6 = scalar_lea.vmem %s1256_s14, 256  ;;  %p1324_p0 = scmp.ne.s32.totalorder %s1319_s29, 0 }
  0x72   : > { %v856_v23 = vld [vmem:[#allocation7 + $0x30] sm:$0xff]   ;;  %v858_v25 = vld [vmem:[#allocation7 + $0x38] sm:$0xff]   ;;  %p946_p8 = scmp.ne.s32.totalorder %s1256_s14, %s945_s6  ;;  %s1025_s22 = smov [#allocation8]  }
  0x73   : > { %737 = vmatpush3.bf16.msra.mxu1 %v846_v12  ;;  %v285_v29 = vld [vmem:[%s1307_s2] sm:$0x3]  ;;  %s949_s8 = sshll.u32 %s1025_s22, 4  ;;  %s950_s8 = int_to_ptr.vmem [resolvable:$false] %s949_s8 }
  0x74   : > { %351 = vmatpush1.bf16.msra.mxu0 %v838_v6  ;;  %738 = vmatprep.subr.bf16.mxu1 %v847_v13  ;;  %v290_v31 = vrot.slane %v285_v29, %v289_v28  ;;  %v294_v32 = vrot.slane %v285_v29, %v293_v30  ;;  %v710_v52 = vld [vmem:[%s1309_s4] ss:$0 sm:$0xff]  ;;  %p947_p1 = pnand %p946_p8, %p1324_p0  ;;  %s951_s9 = scalar_lea.vmem %s950_s8, 512 }
  0x75   : > { %352 = vmatprep.subr.bf16.mxu0 %v839_v7  ;;  %p952_p5 = scmp.lt.s32.totalorder %s1256_s14, %s950_s8  ;;  %p953_p9 = scmp.lt.s32.totalorder %s951_s9, %s945_s6 }
  0x76   : > { %p948_p3 = pneg %p947_p1 }
  0x77   : > { %739 = vmatpush3.bf16.msra.mxu1 %v848_v15  ;;  %p954_p12 = por %p953_p9, %p952_p5 }
  0x78   : > { %353 = vmatpush1.bf16.msra.mxu0 %v841_v10  ;;  %740 = vmatprep.subr.bf16.mxu1 %v849_v16 }
  0x79   : > { %p955_p2 = pnand %p954_p12, %p948_p3 }
  0x7b   : > { %709 = vmatmul.mubr.msk.bf16.vlgmr.msra.gmra.mrb[0].mxu0 %vm342_vm0, %v842_v14  ;;  %741 = vmatpush3.bf16.msra.mxu1 %v850_v17 }
  0x7c   : > { %742 = vmatprep.subr.bf16.mxu1 %v851_v18 }
  0x7f   : > { %743 = vmatpush3.bf16.msra.mxu1 %v852_v19 }
  0x80   : > { %744 = vmatprep.subr.bf16.mxu1 %v853_v20 }
  0x83   : > { %745 = vmatpush3.bf16.msra.mxu1 %v854_v21 }
  0x84   : > { %746 = vmatprep.subr.bf16.mxu1 %v855_v22 }
  0x87   : > { %747 = vmatpush3.bf16.msra.mxu1 %v856_v23 }
  0x88   : > { %748 = vmatprep.subr.bf16.mxu1 %v857_v24 }
  0x8b   : > { %749 = vmatpush3.bf16.msra.mxu1 %v858_v25 }
 0x14e   : > { %v380_v33 = vpop.f32.mrb[0].mxu0 }
 0x14f   : > { %v381_v34 = vadd.f32 %v380_v33, %v290_v31  ;;  %v382_v35 = vpop.f32.mrb[1].mxu0 }
 0x150   : > { %v383_v36 = vadd.f32 %v382_v35, %v294_v32  ;;  %v384_v37 = vpop.f32.mrb[2].mxu0 }
 0x151   : > { %v393_v38 = vmul.f32 0.01, %v381_v34  ;;  %v385_v39 = vadd.f32 %v384_v37, %v290_v31  ;;  %v386_v40 = vpop.f32.mrb[3].mxu0  ;;  %vm389_vm1 = vcmp.gt.f32.partialorder %v381_v34, 0.0 }
 0x152   : > { %v394_v41 = vmul.f32 0.01, %v383_v36  ;;  %v387_v42 = vadd.f32 %v386_v40, %v294_v32  ;;  %vm390_vm3 = vcmp.gt.f32.partialorder %v383_v36, 0.0 }
 0x153   : > { %vm391_vm2 = vcmp.gt.f32.partialorder %v385_v39, 0.0  ;;  %v395_v43 = vmul.f32 0.01, %v385_v39  ;;  %v397_v45 = vsel %vm389_vm1, %v381_v34, %v393_v38 }
 0x154   : > { %v396_v44 = vmul.f32 0.01, %v387_v42  ;;  %vm392_vm4 = vcmp.gt.f32.partialorder %v387_v42, 0.0  ;;  %v398_v47 = vsel %vm390_vm3, %v383_v36, %v394_v41 }
 0x155   : > { %v399_v46 = vsel %vm391_vm2, %v385_v39, %v395_v43 }
 0x156   : > { %v400_v48 = vsel %vm392_vm4, %v387_v42, %v396_v44  ;;  %v401_v49 = vpack.c.bf16 %v399_v46, %v397_v45 }
 0x157   : > { %v402_v50 = vpack.c.bf16 %v400_v48, %v398_v47 }
 0x159   : > { %570 = vmatprep.mubr.bf16.mxu1 %v402_v50 }
 0x15a   : > { %571 = vmatmul.mubr.bf16.vlgmr.msra.gmra.mrb[0].mxu1 %v401_v49 }
 0x22d   : > { %v750_v51 = vpop.f32.mrb[0].mxu1 }
 0x22e   : > { %v751_v53 = vpop.f32.mrb[1].mxu1 }
 0x22f   : > { %v752_v54 = vadd.f32 %v751_v53, %v750_v51  ;;  %v753_v55 = vpop.f32.mrb[2].mxu1 }
 0x230   : > { %v754_v56 = vpop.f32.mrb[3].mxu1 }
 0x231   : > { %v573_v57 = vadd.f32 %v752_v54, %v710_v52  ;;  %v755_v58 = vadd.f32 %v754_v56, %v753_v55 }
 0x233   : > { %579 = vst [vmem:[%s271_s28] sm:$0xff] %v573_v57  ;;  %v576_v59 = vadd.f32 %v755_v58, %v710_v52 }
 0x235   : > { %580 = vst [vmem:[%s271_s28 + $0x8] sm:$0xff] %v576_v59 }
 0x236   : > { %958 = shalt.err (!%p955_p2)
}
 0x237   : > { %s959_s24 = scalar_lea.hbm %s1261_s23, 256  ;;  %s963_s13 = scalar_lea.hbm %s1310_s5, 512 }
 0x238   : > { %p960_p13 = scmp.ne.s32.totalorder %s1261_s23, %s959_s24  ;;  %p964_p4 = scmp.lt.u32.totalorder %s1261_s23, %s1310_s5 }
 0x239   : > { %p965_p7 = scmp.lt.u32.totalorder %s963_s13, %s959_s24  ;;  %p967_p8 = scmp.lt.u32.totalorder %s959_s24, %s1261_s23 }
 0x23a   : > { %p961_p6 = pnand %p960_p13, %p1324_p0 }
 0x23b   : > { %p966_p11 = por %p965_p7, %p964_p4 }
 0x23c   : > { %p962_p10 = pneg %p961_p6 }
 0x23d   : > { %p968_p1 = por %p967_p8, %p966_p11 }
 0x23f   : > { %p969_p3 = pnand %p968_p1, %p962_p10 }
 0x241   : > { %972 = shalt.err (!%p969_p3)
}
 0x242   : > { %s1026_s15 = smov 128   ;;  %s1027_s30 = smov 8  }
 0x243   : > { %766 = dma.vmem_to_hbm [thread:$0]  (%p1324_p0), %s1256_s14, 256, %s1261_s23, %s582_s7, %s1026_s15, %s1026_s15, %s1027_s30  }
 0x244 PF: > { %s610_s11 = sand.u32 1, %s1003_s18   ;;  %p1325_p5 = scmp.ne.s32.totalorder %s1315_s25, 0 }
 0x245   : > { %p1326_p9 = scmp.ge.s32.totalorder %s1015_s21, 2  ;;  %s611_s6 = scalar_lea.sflag [#allocation4], %s610_s11 }
 0x247   : > { %p780_p12 = pnand %p1326_p9, %p1325_p5 }
 0x249   : > { %998 = dma.done.wait (!%p780_p12), %s611_s6, 256  }
 0x24a   : > { %1000 = vsyncadd (!%p780_p12), %s611_s6, 4294967040  ;;  %p19_p2 = scmp.ge.s32.totalorder %s1171_s16, 4   ;;  %s1327_s18 = smov %s1007_s19 }
 0x24b   : > { %s1328_s19 = smov %s1011_s20  ;;  %s1329_s20 = smov %s1180_s27 }
 0x24c   : > { %s1330_s21 = smov %s1171_s16  ;;  %21 = sbr.rel (!%p19_p2) target bundleno = 6 (0x6), region = 93 }
 0x253   :  { %616 = vsyncpa [#allocation3], 1 }
 0x254   :  { %618 = vsyncpa [#allocation3 + $0x1], 1 }
 0x255   :  { %619 = vsyncpa [#allocation6], 1 }
 0x256   :  { %620 = vsyncpa [#allocation4], 1 }
 0x257   :  { %622 = vsyncpa [#allocation4 + $0x1], 1 }

</bundles_post_ra>
